<compile_context>
chip_gen: v7x
topology: tpu7x:2x2x1
jax: 0.10.0
libtpu: 0.0.40
codegen_flags: <defaults>
</compile_context>

<pallas_src>
import math
import functools

import jax
import jax.numpy as jnp
import numpy as np
from jax.experimental import pallas as pl
from jax.experimental.pallas import tpu as pltpu


def _arcface_kernel(logits_ref, labels_ref, tcos_ref, ms_ref, loss_ref,
                    m_ref, l_ref, t_ref, *, s, block_c, num_classes, mask_cols):
    # logits_ref: (TB, TC) input dtype   labels_ref: (TB, 1) i32
    # tcos_ref:   (TB, 1) f32 target-column cosine
    # ms_ref:     (TB, 1) f32 adaptive margin per row
    # loss_ref:   (TB, 1) f32 per-row loss (written on last class tile)
    # scratch:    m_ref / l_ref / t_ref all (TB, 1) f32
    k = pl.program_id(1)

    @pl.when(k == 0)
    def _():
        # Per-row margin trig on a (TB, 1) vector only (EUP work ~ TB, not TB*TC).
        c_t = tcos_ref[...]                                   # (TB, 1)
        marg = ms_ref[...]                                    # (TB, 1)
        cos_m = jnp.cos(marg)
        sin_m = jnp.sin(marg)
        th = jnp.cos(math.pi - marg)
        mm = jnp.sin(math.pi - marg) * marg
        sine_t = jnp.sqrt(jnp.maximum(1.0 - c_t * c_t, 0.0))  # clamp: no NaN
        phi_t = c_t * cos_m - sine_t * sin_m
        phi_t = jnp.where(c_t > th, phi_t, c_t - mm)
        t_ref[...] = phi_t * s                                # scaled target logit
        m_ref[...] = jnp.full_like(m_ref, -jnp.inf)
        l_ref[...] = jnp.zeros_like(l_ref)

    # Dense path for this class tile: scaled cosine; target column swapped to
    # the margin-adjusted target logit via a single select (same iota also
    # masks ragged-edge padding columns when C is not a tile multiple).
    tile = logits_ref[...].astype(jnp.float32) * s            # (TB, TC)
    tb, tc = tile.shape
    col = jax.lax.broadcasted_iota(jnp.int32, (tb, tc), 1) + k * block_c
    if mask_cols:
        # Stale/undefined columns past C must not contribute to the LSE.
        tile = jnp.where(col < num_classes, tile, jnp.float32(-1e30))
    out = jnp.where(col == labels_ref[...], t_ref[...], tile)

    # Online log-sum-exp accumulation across class tiles.
    m_prev = m_ref[...]
    m_new = jnp.maximum(m_prev, jnp.max(out, axis=-1, keepdims=True))
    l_ref[...] = l_ref[...] * jnp.exp(m_prev - m_new) + jnp.sum(
        jnp.exp(out - m_new), axis=-1, keepdims=True)
    m_ref[...] = m_new

    @pl.when(k == pl.num_programs(1) - 1)
    def _():
        lse = m_ref[...] + jnp.log(l_ref[...])
        # cross-entropy against the one-hot target = lse - target logit
        loss_ref[...] = lse - t_ref[...]


def arcface_loss_adaptive_margin(logits, labels, margins, *, s=30.0,
                                 block_b=128, block_c=2048):
    """logits: (B, out_dim) float (f32/bf16), labels: (B,) int, margins: (out_dim,)."""
    B, C = logits.shape
    labels = labels.astype(jnp.int32)

    # Glue: per-row adaptive margin and the target-column cosine (two O(B) gathers).
    ms = margins.astype(jnp.float32)[labels].reshape(B, 1)
    tcos = jnp.take_along_axis(logits, labels[:, None], axis=1).astype(jnp.float32)
    labels2d = labels.reshape(B, 1)

    # Block dims must be multiples of (8, 128) or span the whole array dim.
    # Ragged tails are handled in-kernel, so the (B, C) matrix is never padded
    # or copied in HBM.
    tb = B if B <= block_b else max(8, (block_b // 8) * 8)
    tc = C if C <= block_c else max(128, (block_c // 128) * 128)
    grid = (pl.cdiv(B, tb), pl.cdiv(C, tc))
    mask_cols = (C % tc) != 0

    per_row = pl.pallas_call(
        functools.partial(_arcface_kernel, s=float(s), block_c=tc,
                          num_classes=C, mask_cols=mask_cols),
        out_shape=jax.ShapeDtypeStruct((B, 1), jnp.float32),
        grid_spec=pltpu.PrefetchScalarGridSpec(
            num_scalar_prefetch=0,
            grid=grid,
            in_specs=[
                pl.BlockSpec((tb, tc), lambda i, k: (i, k)),   # logits
                pl.BlockSpec((tb, 1), lambda i, k: (i, 0)),    # labels
                pl.BlockSpec((tb, 1), lambda i, k: (i, 0)),    # target cosine
                pl.BlockSpec((tb, 1), lambda i, k: (i, 0)),    # per-row margin
            ],
            out_specs=pl.BlockSpec((tb, 1), lambda i, k: (i, 0)),
            scratch_shapes=[pltpu.VMEM((tb, 1), jnp.float32)] * 3,
        ),
        compiler_params=pltpu.CompilerParams(
            dimension_semantics=("parallel", "arbitrary"),
            vmem_limit_bytes=32 * 1024 * 1024,
        ),
    )(logits, labels2d, tcos, ms)

    return jnp.mean(per_row[:, 0])


def _reference(logits, labels, margins, s=30.0):
    # Pure-JAX reference mirroring the PyTorch module exactly.
    ms = margins[labels].astype(jnp.float32)
    cos_m = jnp.cos(ms)[:, None]
    sin_m = jnp.sin(ms)[:, None]
    th = jnp.cos(math.pi - ms)[:, None]
    mm = (jnp.sin(math.pi - ms) * ms)[:, None]
    onehot = jax.nn.one_hot(labels, logits.shape[1], dtype=jnp.float32)
    cosine = logits.astype(jnp.float32)
    sine = jnp.sqrt(1.0 - cosine ** 2)
    phi = cosine * cos_m - sine * sin_m
    phi = jnp.where(cosine > th, phi, cosine - mm)
    output = (onehot * phi + (1.0 - onehot) * cosine) * s
    logprobs = jax.nn.log_softmax(output, axis=-1)
    return jnp.mean(jnp.sum(-logprobs * onehot, axis=-1))


if __name__ == "__main__":
    # Deliberately ragged shapes: B=14 (not a multiple of 8), C=500 (not a
    # multiple of 128) so both in-kernel ragged-edge paths are exercised.
    B, OUT_DIM = 14, 500
    key = jax.random.PRNGKey(0)
    k_logits, k_labels, k_margins = jax.random.split(key, 3)

    # logits are cosine similarities in (-1, 1)
    logits = jax.random.uniform(k_logits, (B, OUT_DIM), jnp.float32,
                                minval=-0.99, maxval=0.99)
    labels = jax.random.randint(k_labels, (B,), 0, OUT_DIM, dtype=jnp.int32)
    # deterministic per-class adaptive margins in [0.2, 0.5]
    margins = jax.random.uniform(k_margins, (OUT_DIM,), jnp.float32,
                                 minval=0.2, maxval=0.5)

    # Small blocks so the test exercises both grid axes (2 batch x 4 class tiles)
    # plus the ragged batch tail and the masked ragged class tail.
    loss = arcface_loss_adaptive_margin(logits, labels, margins, s=30.0,
                                        block_b=8, block_c=128)
    loss = jax.block_until_ready(loss)

    ref = jax.block_until_ready(_reference(logits, labels, margins, s=30.0))
    assert np.allclose(np.asarray(loss), np.asarray(ref), rtol=1e-4, atol=1e-5), (
        loss, ref)
    print("KERNEL_OK")
</pallas_src>

<mosaic_0001>
module attributes {stable_mosaic.version = 11 : i64} {
  func.func @_arcface_kernel(%arg0: i32, %arg1: i32, %arg2: memref<8x128xf32, #tpu.memory_space<vmem>>, %arg3: memref<8x1xi32, #tpu.memory_space<vmem>>, %arg4: memref<8x1xf32, #tpu.memory_space<vmem>>, %arg5: memref<8x1xf32, #tpu.memory_space<vmem>>, %arg6: memref<8x1xf32, #tpu.memory_space<vmem>>, %arg7: memref<8x1xf32, #tpu.memory_space<vmem>>, %arg8: memref<8x1xf32, #tpu.memory_space<vmem>>, %arg9: memref<8x1xf32, #tpu.memory_space<vmem>>) attributes {dimension_semantics = [#tpu.dimension_semantics<parallel>, #tpu.dimension_semantics<arbitrary>], iteration_bounds = array<i64: 2, 4>, scalar_prefetch = 0 : i64, scratch_operands = 3 : i64, tpu.core_type = #tpu.core_type<tc>, window_params = [{transform_indices = @transform_0, window_bounds = array<i64: 8, 128>}, {transform_indices = @transform_1, window_bounds = array<i64: 8, 1>}, {transform_indices = @transform_2, window_bounds = array<i64: 8, 1>}, {transform_indices = @transform_3, window_bounds = array<i64: 8, 1>}, {transform_indices = @transform_4, window_bounds = array<i64: 8, 1>}]} {
    %c0_i32 = arith.constant 0 : i32
    %0 = arith.cmpi eq, %arg1, %c0_i32 : i32
    %1 = arith.extui %0 : i1 to i32
    %c0_i32_0 = arith.constant 0 : i32
    %2 = arith.cmpi ne, %1, %c0_i32_0 : i32
    scf.if %2 {
      %c0_18 = arith.constant 0 : index
      %c0_19 = arith.constant 0 : index
      %40 = vector.load %arg4[%c0_18, %c0_19] : memref<8x1xf32, #tpu.memory_space<vmem>>, vector<8x1xf32>
      %c0_20 = arith.constant 0 : index
      %c0_21 = arith.constant 0 : index
      %41 = vector.load %arg5[%c0_20, %c0_21] : memref<8x1xf32, #tpu.memory_space<vmem>>, vector<8x1xf32>
      %42 = math.cos %41 : vector<8x1xf32>
      %43 = math.sin %41 : vector<8x1xf32>
      %cst_22 = arith.constant 3.14159274 : f32
      %44 = vector.broadcast %cst_22 : f32 to vector<8x1xf32>
      %45 = arith.subf %44, %41 : vector<8x1xf32>
      %46 = math.cos %45 : vector<8x1xf32>
      %cst_23 = arith.constant 3.14159274 : f32
      %47 = vector.broadcast %cst_23 : f32 to vector<8x1xf32>
      %48 = arith.subf %47, %41 : vector<8x1xf32>
      %49 = math.sin %48 : vector<8x1xf32>
      %50 = arith.mulf %49, %41 : vector<8x1xf32>
      %51 = arith.mulf %40, %40 : vector<8x1xf32>
      %cst_24 = arith.constant 1.000000e+00 : f32
      %52 = vector.broadcast %cst_24 : f32 to vector<8x1xf32>
      %53 = arith.subf %52, %51 : vector<8x1xf32>
      %cst_25 = arith.constant 0.000000e+00 : f32
      %54 = vector.broadcast %cst_25 : f32 to vector<8x1xf32>
      %55 = arith.maximumf %53, %54 : vector<8x1xf32>
      %56 = math.sqrt %55 : vector<8x1xf32>
      %57 = arith.mulf %40, %42 : vector<8x1xf32>
      %58 = arith.mulf %56, %43 : vector<8x1xf32>
      %59 = arith.subf %57, %58 : vector<8x1xf32>
      %60 = arith.cmpf ogt, %40, %46 : vector<8x1xf32>
      %61 = arith.subf %40, %50 : vector<8x1xf32>
      %62 = arith.select %60, %59, %61 : vector<8x1xi1>, vector<8x1xf32>
      %cst_26 = arith.constant 3.000000e+01 : f32
      %63 = vector.broadcast %cst_26 : f32 to vector<8x1xf32>
      %64 = arith.mulf %62, %63 : vector<8x1xf32>
      %c0_27 = arith.constant 0 : index
      %c0_28 = arith.constant 0 : index
      %65 = vector.load %arg9[%c0_27, %c0_28] : memref<8x1xf32, #tpu.memory_space<vmem>>, vector<8x1xf32>
      tpu.vector_store %arg9[%c0_27, %c0_28], %64 {strides = array<i32>} : memref<8x1xf32, #tpu.memory_space<vmem>>, vector<8x1xf32>,
      %cst_29 = arith.constant 0xFF800000 : f32
      %66 = vector.broadcast %cst_29 : f32 to vector<8x1xf32>
      %c0_30 = arith.constant 0 : index
      %c0_31 = arith.constant 0 : index
      %67 = vector.load %arg7[%c0_30, %c0_31] : memref<8x1xf32, #tpu.memory_space<vmem>>, vector<8x1xf32>
      tpu.vector_store %arg7[%c0_30, %c0_31], %66 {strides = array<i32>} : memref<8x1xf32, #tpu.memory_space<vmem>>, vector<8x1xf32>,
      %cst_32 = arith.constant 0.000000e+00 : f32
      %68 = vector.broadcast %cst_32 : f32 to vector<8x1xf32>
      %c0_33 = arith.constant 0 : index
      %c0_34 = arith.constant 0 : index
      %69 = vector.load %arg8[%c0_33, %c0_34] : memref<8x1xf32, #tpu.memory_space<vmem>>, vector<8x1xf32>
      tpu.vector_store %arg8[%c0_33, %c0_34], %68 {strides = array<i32>} : memref<8x1xf32, #tpu.memory_space<vmem>>, vector<8x1xf32>,
    } else {
    }
    %c0 = arith.constant 0 : index
    %c0_1 = arith.constant 0 : index
    %3 = vector.load %arg2[%c0, %c0_1] : memref<8x128xf32, #tpu.memory_space<vmem>>, vector<8x128xf32>
    %cst = arith.constant 3.000000e+01 : f32
    %4 = vector.broadcast %cst : f32 to vector<8x128xf32>
    %5 = arith.mulf %3, %4 : vector<8x128xf32>
    %6 = tpu.iota {dimensions = array<i32: 1>} : vector<8x128xi32>
    %c128_i32 = arith.constant 128 : i32
    %7 = arith.muli %arg1, %c128_i32 : i32
    %8 = vector.broadcast %7 : i32 to vector<8x128xi32>
    %9 = arith.addi %6, %8 : vector<8x128xi32>
    %c500_i32 = arith.constant 500 : i32
    %10 = vector.broadcast %c500_i32 : i32 to vector<8x128xi32>
    %11 = arith.cmpi slt, %9, %10 : vector<8x128xi32>
    %cst_2 = arith.constant -1.000000e+30 : f32
    %12 = vector.broadcast %cst_2 : f32 to vector<8x128xf32>
    %13 = arith.select %11, %5, %12 : vector<8x128xi1>, vector<8x128xf32>
    %c0_3 = arith.constant 0 : index
    %c0_4 = arith.constant 0 : index
    %14 = vector.load %arg3[%c0_3, %c0_4] : memref<8x1xi32, #tpu.memory_space<vmem>>, vector<8x1xi32>
    %15 = vector.broadcast %14 : vector<8x1xi32> to vector<8x128xi32>
    %16 = arith.cmpi eq, %9, %15 : vector<8x128xi32>
    %c0_5 = arith.constant 0 : index
    %c0_6 = arith.constant 0 : index
    %17 = vector.load %arg9[%c0_5, %c0_6] : memref<8x1xf32, #tpu.memory_space<vmem>>, vector<8x1xf32>
    %18 = vector.shape_cast %17 : vector<8x1xf32> to vector<8x1xf32>
    %19 = vector.broadcast %18 : vector<8x1xf32> to vector<8x128xf32>
    %20 = arith.select %16, %19, %13 : vector<8x128xi1>, vector<8x128xf32>
    %c0_7 = arith.constant 0 : index
    %c0_8 = arith.constant 0 : index
    %21 = vector.load %arg7[%c0_7, %c0_8] : memref<8x1xf32, #tpu.memory_space<vmem>>, vector<8x1xf32>
    %cst_9 = arith.constant dense<0xFF800000> : vector<8xf32>
    %22 = vector.multi_reduction <maximumf>, %20, %cst_9 [1] : vector<8x128xf32> to vector<8xf32>
    %23 = vector.shape_cast %22 : vector<8xf32> to vector<8x1xf32>
    %24 = arith.maximumf %21, %23 : vector<8x1xf32>
    %c0_10 = arith.constant 0 : index
    %c0_11 = arith.constant 0 : index
    %25 = vector.load %arg8[%c0_10, %c0_11] : memref<8x1xf32, #tpu.memory_space<vmem>>, vector<8x1xf32>
    %26 = arith.subf %21, %24 : vector<8x1xf32>
    %27 = math.exp %26 : vector<8x1xf32>
    %28 = arith.mulf %25, %27 : vector<8x1xf32>
    %29 = vector.broadcast %24 : vector<8x1xf32> to vector<8x128xf32>
    %30 = arith.subf %20, %29 : vector<8x128xf32>
    %31 = math.exp %30 : vector<8x128xf32>
    %cst_12 = arith.constant dense<0.000000e+00> : vector<8xf32>
    %32 = vector.multi_reduction <add>, %31, %cst_12 [1] : vector<8x128xf32> to vector<8xf32>
    %33 = vector.shape_cast %32 : vector<8xf32> to vector<8x1xf32>
    %34 = arith.addf %28, %33 : vector<8x1xf32>
    %c0_13 = arith.constant 0 : index
    %c0_14 = arith.constant 0 : index
    %35 = vector.load %arg8[%c0_13, %c0_14] : memref<8x1xf32, #tpu.memory_space<vmem>>, vector<8x1xf32>
    tpu.vector_store %arg8[%c0_13, %c0_14], %34 {strides = array<i32>} : memref<8x1xf32, #tpu.memory_space<vmem>>, vector<8x1xf32>,
    %c0_15 = arith.constant 0 : index
    %c0_16 = arith.constant 0 : index
    %36 = vector.load %arg7[%c0_15, %c0_16] : memref<8x1xf32, #tpu.memory_space<vmem>>, vector<8x1xf32>
    tpu.vector_store %arg7[%c0_15, %c0_16], %24 {strides = array<i32>} : memref<8x1xf32, #tpu.memory_space<vmem>>, vector<8x1xf32>,
    %c3_i32 = arith.constant 3 : i32
    %37 = arith.cmpi eq, %arg1, %c3_i32 : i32
    %38 = arith.extui %37 : i1 to i32
    %c0_i32_17 = arith.constant 0 : i32
    %39 = arith.cmpi ne, %38, %c0_i32_17 : i32
    scf.if %39 {
      %c0_18 = arith.constant 0 : index
      %c0_19 = arith.constant 0 : index
      %40 = vector.load %arg7[%c0_18, %c0_19] : memref<8x1xf32, #tpu.memory_space<vmem>>, vector<8x1xf32>
      %c0_20 = arith.constant 0 : index
      %c0_21 = arith.constant 0 : index
      %41 = vector.load %arg8[%c0_20, %c0_21] : memref<8x1xf32, #tpu.memory_space<vmem>>, vector<8x1xf32>
      %42 = math.log %41 : vector<8x1xf32>
      %43 = arith.addf %40, %42 : vector<8x1xf32>
      %c0_22 = arith.constant 0 : index
      %c0_23 = arith.constant 0 : index
      %44 = vector.load %arg9[%c0_22, %c0_23] : memref<8x1xf32, #tpu.memory_space<vmem>>, vector<8x1xf32>
      %45 = arith.subf %43, %44 : vector<8x1xf32>
      %c0_24 = arith.constant 0 : index
      %c0_25 = arith.constant 0 : index
      %46 = vector.load %arg6[%c0_24, %c0_25] : memref<8x1xf32, #tpu.memory_space<vmem>>, vector<8x1xf32>
      tpu.vector_store %arg6[%c0_24, %c0_25], %45 {strides = array<i32>} : memref<8x1xf32, #tpu.memory_space<vmem>>, vector<8x1xf32>,
    } else {
    }
    return
  }
  func.func @transform_0(%arg0: i32, %arg1: i32) -> (i32, i32) {
    %c0_i32 = arith.constant 0 : i32
    return %arg0, %arg1 : i32, i32
  }
  func.func @transform_1(%arg0: i32, %arg1: i32) -> (i32, i32) {
    %c0_i32 = arith.constant 0 : i32
    %c0_i32_0 = arith.constant 0 : i32
    return %arg0, %c0_i32 : i32, i32
  }
  func.func @transform_2(%arg0: i32, %arg1: i32) -> (i32, i32) {
    %c0_i32 = arith.constant 0 : i32
    %c0_i32_0 = arith.constant 0 : i32
    return %arg0, %c0_i32 : i32, i32
  }
  func.func @transform_3(%arg0: i32, %arg1: i32) -> (i32, i32) {
    %c0_i32 = arith.constant 0 : i32
    %c0_i32_0 = arith.constant 0 : i32
    return %arg0, %c0_i32 : i32, i32
  }
  func.func @transform_4(%arg0: i32, %arg1: i32) -> (i32, i32) {
    %c0_i32 = arith.constant 0 : i32
    %c0_i32_0 = arith.constant 0 : i32
    return %arg0, %c0_i32 : i32, i32
  }
}

</mosaic_0001>

<bundles_post_ra>
// kernel: tpu_custom_call.1
= control target key start
LH: loop header
LB: loop body
LE: loop exit
PB: predicated region body
PF: predicated region fallthrough
CT: control target
= control target key end

     0   :  { %9 = vsyncpa [#allocation6], 0  ;;  %s1428_s0 = inlined_call_operand.hbm [shape: f32[14,500], index: 0, kind: input, shape index: {}]   ;;  %s1429_s1 = inlined_call_operand.vmem [shape: s32[14,1], index: 1, kind: input, shape index: {}]   ;;  %s1430_s2 = inlined_call_operand.vmem [shape: f32[14,1], index: 2, kind: input, shape index: {}]   ;;  %s1431_s3 = inlined_call_operand.vmem [shape: f32[14,1], index: 3, kind: input, shape index: {}]   ;;  %s1432_s4 = inlined_call_operand.vmem [shape: f32[14,1], index: 4, kind: output, shape index: {}]  }
   0x1   :  { %11 = vsyncpa [#allocation6 + $0x1], 0  ;;  %s1166_s15 = smov 0   ;;  %s1168_s16 = smov 0  }
   0x2   :  { %s1170_s17 = smov 0   ;;  %s1172_s18 = smov 0  }
   0x3   :  { %s1174_s19 = smov 0   ;;  %s1176_s20 = smov 0  }
   0x4   :  { %s1178_s21 = smov 0   ;;  %s1180_s22 = smov 0  }
   0x5 LB: > { %s893_s23 = sadd.s32 4294967295, %s1129_s22   ;;  %s26_s24 = sadd.s32 1, %s1121_s20  ;;  %s1129_s22 = sphi %s1180_s22, %s17_s22   ;;  %s1125_s21 = sphi %s1178_s21, %s1444_s21   ;;  %s1121_s20 = sphi %s1176_s20, %s1443_s20   ;;  %s1117_s19 = sphi %s1174_s19, %s1442_s19   ;;  %s1113_s18 = sphi %s1172_s18, %s1441_s18   ;;  %s1109_s17 = sphi %s1170_s17, %s1440_s17   ;;  %s1105_s16 = sphi %s1168_s16, %s1439_s16   ;;  %s1101_s15 = sphi %s1166_s15, %s1438_s15  }
   0x6   : > { %p27_p0 = scmp.ge.s32.totalorder %s26_s24, 4  ;;  %s29_s25 = sadd.s32 1, %s1125_s21 }
   0x7   : > { %s38_s26 = sadd.s32 1, %s1109_s17  ;;  %p45_p1 = scmp.ne.s32.totalorder %s1109_s17, %s1105_s16 }
   0x8   : > { %s1446_s24 = smov (%p27_p0, %s26_s24), 0  ;;  %s1448_s25 = smov (!%p27_p0, %s29_s25), %s1125_s21 }
   0x9   : > { %s34_s27 = ssub.s32 %s1121_s20, %s1446_s24  ;;  %p46_p2 = scmp.eq.s32.totalorder %s1129_s22, 0 }
   0xa   : > { %p31_p3 = scmp.ge.s32.totalorder %s1448_s25, 2  ;;  %p51_p4 = scmp.ne.s32.totalorder %s1105_s16, %s1101_s15 }
   0xb   : > { %p1217_p5 = por %p46_p2, %p45_p1  ;;  %p52_p6 = scmp.eq.s32.totalorder %s893_s23, 0 }
   0xc   : > { %s1450_s25 = smov (%p31_p3, %s1448_s25), 0  ;;  %p941_p8 = scmp.lt.s32.totalorder %s1129_s22, 8 }
   0xd   : > { %p1223_p7 = por %p52_p6, %p51_p4  ;;  %s33_s30 = ssub.s32 %s1125_s21, %s1450_s25 }
   0xe   : > { %s35_s5 = sor.u32 %s34_s27, %s33_s30  ;;  %s179_s6 = sand.u32 1, %s1109_s17  }
   0xf   : > { %p36_p9 = scmp.eq.s32.totalorder %s35_s5, 0  ;;  %s897_s7 = sshll.u32 %s179_s6, 3 }
  0x10   : > { %s898_s8 = sshll.u32 %s1125_s21, 2  ;;  %s183_s12 = scalar_lea.vmem [#allocation5], %s897_s7 }
  0x11   : > { %s1233_s9 = scalar_select %p36_p9, %s1109_s17, %s38_s26  }
  0x12   : > { %s188_s10 = sadd.s32 %s1121_s20, %s898_s8  ;;  %s192_s13 = sshll.u32 %s183_s12, 4  ;;  %s1241_s13 = int_to_ptr.vmem [resolvable:$true] %s192_s13 }
  0x13   : > { %s899_s11 = sshll.u32 %s188_s10, 7  ;;  %p1247_p10 = pnand %p941_p8, %p1217_p5 }
  0x14   : > { %s1239_s23 = scalar_lea.hbm %s1428_s0, %s899_s11  ;;  %s180_s27 = scalar_lea.sflag [#allocation6], %s179_s6 }
  0x15   : > { %s1033_s30 = scalar_lea.hbm %s1239_s23, 128  ;;  %p1035_p0 = pneg %p1247_p10 }
  0x16   : > { %p1034_p13 = scmp.ne.s32.totalorder %s1239_s23, %s1033_s30  ;;  %s1038_s7 = scalar_lea.hbm %s1428_s0, 1024 }
  0x17   : > { %p1039_p3 = scmp.lt.u32.totalorder %s1239_s23, %s1428_s0  ;;  %p1040_p4 = scmp.lt.u32.totalorder %s1038_s7, %s1033_s30 }
  0x18   : > { %p1036_p1 = pnand %p1035_p0, %p1034_p13  ;;  %p1042_p6 = scmp.lt.u32.totalorder %s1033_s30, %s1239_s23 }
  0x19   : > { %p1041_p5 = por %p1040_p4, %p1039_p3 }
  0x1a   : > { %p1037_p2 = pneg %p1036_p1 }
  0x1b   : > { %p1043_p8 = por %p1042_p6, %p1041_p5 }
  0x1d   : > { %p1044_p9 = pnand %p1043_p8, %p1037_p2 }
  0x1f   : > { %1047 = shalt.err (!%p1044_p9)
}
  0x20   : > { %s1048_s6 = scalar_lea.vmem %s1241_s13, 128  ;;  %s1131_s11 = smov [#allocation5]  }
  0x21   : > { %p1049_p13 = scmp.ne.s32.totalorder %s1241_s13, %s1048_s6  ;;  %s1053_s12 = sshll.u32 %s1131_s11, 4  ;;  %s1054_s12 = int_to_ptr.vmem [resolvable:$false] %s1053_s12 }
  0x22   : > { %s1055_s14 = scalar_lea.vmem %s1054_s12, 256  ;;  %p1056_p12 = scmp.lt.s32.totalorder %s1241_s13, %s1054_s12 }
  0x23   : > { %p1051_p1 = pnand %p1049_p13, %p1035_p0  ;;  %p1057_p3 = scmp.lt.s32.totalorder %s1055_s14, %s1048_s6 }
  0x25   : > { %p1052_p11 = pneg %p1051_p1  ;;  %p1058_p4 = por %p1057_p3, %p1056_p12 }
  0x27   : > { %p1059_p5 = pnand %p1058_p4, %p1052_p11 }
  0x29   : > { %1062 = shalt.err (!%p1059_p5)
}
  0x2a   : > { %940 = dma.hbm_to_vmem [thread:$0]  (!%p1247_p10), %s1239_s23, 128, %s1241_s13, %s180_s27  }
  0x2b   : > { %p1436_p2 = scmp.lt.s32.totalorder %s1129_s22, 9  ;;  %p1437_p6 = scmp.ge.s32.totalorder %s1129_s22, 1 }
  0x2d   : > { %p219_p0 = pnand %p1437_p6, %p1436_p2 }
  0x2e   : > { %s224_s15 = sand.u32 (!%p219_p0), 1, %s1105_s16  }
  0x2f   : > { %222 = sbr.rel (%p219_p0) target bundleno = 753 (0x2f1), region = 36  ;;  %s1283_s30 = sshll.u32 (!%p219_p0), %s224_s15, 3 }
  0x30   : > { %s225_s5 = scalar_lea.sflag (!%p219_p0), [#allocation6], %s224_s15  ;;  %s228_s28 = scalar_lea.vmem (!%p219_p0), [#allocation5], %s1283_s30 }
  0x36   : > { %1096 = dma.done.wait (%p1223_p7), %s225_s5, 128  }
  0x37   : > { %1098 = vsyncadd (%p1223_p7), %s225_s5, 4294967168  ;;  %p264_p10 = scmp.lt.s32.totalorder %s1117_s19, 1  ;;  %p906_p7 = scmp.ne.s32.totalorder %s1113_s18, 0 }
  0x38   : > { %vm719_vm0 = vcmask (!%p906_p7), 7168   ;;  %v1132_v7 = vmov (!%p906_p7), -inf   ;;  %v1133_v8 = vmov (!%p906_p7), 0.0   ;;  %v1134_v22 = vmov (!%p906_p7), 683565275  }
  0x39   : > { %s1452_s19 = smov (!%p264_p10, %s1117_s19), 1  ;;  %283 = sbr.rel (%p906_p7) target bundleno = 160 (0xa0), region = 44 }
  0x3a   : > { %s1292_s13 = sshll.u32 %s1452_s19, 3  ;;  %721 = vst.msk [vmem:[#allocation2] sm:$0xff] (!%p906_p7), %vm719_vm0, %v1132_v7  ;;  %722 = vst.msk [vmem:[#allocation3] sm:$0xff] (!%p906_p7), %vm719_vm0, %v1133_v8  ;;  %v1135_v24 = vmov (!%p906_p7), 2475754826  }
  0x3b   : > { %s267_s27 = scalar_lea.vmem %s1429_s1, %s1292_s13  ;;  %s271_s10 = scalar_lea.vmem %s1430_s2, %s1292_s13  ;;  %v1136_v26 = vmov (!%p906_p7), 2131351028   ;;  %v1137_v28 = vmov (!%p906_p7), 2102212464   ;;  %v1138_v30 = vmov (!%p906_p7), 920167782  }
  0x3c   : > { %s275_s11 = scalar_lea.vmem %s1431_s3, %s1292_s13  ;;  %s279_s19 = scalar_lea.vmem %s1432_s4, %s1292_s13  ;;  %v1139_v38 = vmov (!%p906_p7), 1326507024  }
  0x3d   : > { %v1311_v0 = vld [vmem:[%s275_s11] sm:$0xff] (!%p906_p7) }
  0x3e   : > { %v286_v1 = vand.u32 (!%p906_p7), 2147483647, %v1311_v0  ;;  %v289_v2 = vand.u32 (!%p906_p7), 2139095040, %v1311_v0  ;;  %v1318_v5 = vsub.f32 (!%p906_p7), 3.1415927, %v1311_v0  ;;  %vm288_vm15 = vcmp.lt.s32.totalorder (!%p906_p7), %v1311_v0, 0 }
  0x40   : > { %v290_v3 = vshrl.u32 %v289_v2, 23  ;;  %v293_v4 = vand.u32 8388607, %v286_v1  ;;  %v494_v9 = vand.u32 2147483647, %v1318_v5  ;;  %v497_v10 = vand.u32 2139095040, %v1318_v5 }
  0x42   : > { %v907_v6 = vadd.s32 4294967169, %v290_v3  ;;  %v294_v12 = vor.u32 8388608, %v293_v4  ;;  %v498_v13 = vshrl.u32 %v497_v10, 23  ;;  %v501_v16 = vand.u32 8388607, %v494_v9 }
  0x44   : > { %v296_v11 = vadd.s32 1, %v907_v6  ;;  %v915_v15 = vadd.s32 4294967169, %v498_v13  ;;  %v1326_v19 = vshll.u32 %v294_v12, 8  ;;  %v502_v32 = vor.u32 8388608, %v501_v16 }
  0x46   : > { %vm297_vm1 = vcmp.gt.s32.totalorder %v296_v11, 0  ;;  %v504_v20 = vadd.s32 1, %v915_v15  ;;  %v542_v60 = vshll.u32 %v502_v32, 8 }
  0x47   : > { %v298_v14 = vsel %vm297_vm1, %v296_v11, 0  ;;  %vm287_vm1 = vcmp.le.f32.partialorder %v286_v1, 0.7853982 }
  0x48   : > { %v299_v17 = vshrl.u32 %v298_v14, 5  ;;  %v300_v18 = vand.u32 31, %v298_v14  ;;  %vm505_vm5 = vcmp.gt.s32.totalorder %v504_v20, 0 }
  0x49   : > { %v506_v45 = vsel %vm505_vm5, %v504_v20, 0 }
  0x4a   : > { %v301_v21 = vsub.s32 32, %v300_v18  ;;  %v303_v23 = vshll.u32 %v1134_v22, %v300_v18  ;;  %v306_v25 = vshll.u32 %v1135_v24, %v300_v18  ;;  %v309_v27 = vshll.u32 %v1136_v26, %v300_v18 }
  0x4b   : > { %v312_v29 = vshll.u32 %v1137_v28, %v300_v18  ;;  %v315_v31 = vshll.u32 %v1138_v30, %v300_v18  ;;  %vm318_vm2 = vcmp.lt.s32.totalorder %v299_v17, 1  ;;  %vm319_vm3 = vcmp.lt.s32.totalorder %v299_v17, 2 }
  0x4c   : > { %v302_v33 = vshrl.u32 %v1134_v22, %v301_v21  ;;  %v304_v34 = vshrl.u32 %v1135_v24, %v301_v21  ;;  %v307_v35 = vshrl.u32 %v1136_v26, %v301_v21  ;;  %v310_v36 = vshrl.u32 %v1137_v28, %v301_v21 }
  0x4d   : > { %v313_v37 = vshrl.u32 %v1138_v30, %v301_v21  ;;  %v316_v39 = vshrl.u32 %v1139_v38, %v301_v21  ;;  %vm321_vm4 = vcmp.lt.s32.totalorder %v299_v17, 4  ;;  %vm320_vm6 = vcmp.lt.s32.totalorder %v299_v17, 3 }
  0x4e   : > { %v305_v40 = vor.u32 %v304_v34, %v303_v23  ;;  %v308_v41 = vor.u32 %v307_v35, %v306_v25  ;;  %v311_v42 = vor.u32 %v310_v36, %v309_v27  ;;  %v507_v55 = vshrl.u32 %v506_v45, 5 }
  0x4f   : > { %v314_v43 = vor.u32 %v313_v37, %v312_v29  ;;  %v317_v44 = vor.u32 %v316_v39, %v315_v31  ;;  %v508_v56 = vand.u32 31, %v506_v45 }
  0x50   : > { %v322_v46 = vsel %vm318_vm2, %v302_v33, %v305_v40  ;;  %v323_v47 = vsel %vm321_vm4, %v311_v42, 2102212464  ;;  %v326_v48 = vsel %vm318_vm2, %v305_v40, %v308_v41  ;;  %v330_v49 = vsel %vm318_vm2, %v308_v41, %v311_v42 }
  0x51   : > { %v324_v50 = vsel %vm320_vm6, %v308_v41, %v323_v47  ;;  %v327_v51 = vsel %vm321_vm4, %v314_v43, 920167782  ;;  %v331_v52 = vsel %vm321_vm4, %v317_v44, 1326507024  ;;  %v509_v3 = vsub.s32 32, %v508_v56 }
  0x52   : > { %v328_v53 = vsel %vm320_vm6, %v311_v42, %v327_v51  ;;  %v332_v54 = vsel %vm320_vm6, %v314_v43, %v331_v52  ;;  %v325_v57 = vsel %vm319_vm3, %v322_v46, %v324_v50  ;;  %v511_v4 = vshll.u32 %v1134_v22, %v508_v56 }
  0x53   : > { %v329_v58 = vsel %vm319_vm3, %v326_v48, %v328_v53  ;;  %v333_v59 = vsel %vm319_vm3, %v330_v49, %v332_v54  ;;  %v514_v6 = vshll.u32 %v1135_v24, %v508_v56  ;;  %v517_v7 = vshll.u32 %v1136_v26, %v508_v56 }
  0x54   : > { %v1335_v61 = vmul.u32.u64.low %v1326_v19, %v333_v59  ;;  %v1336_v62 = vmul.u32.u64.high %v1326_v19, %v333_v59, %v1335_v61  ;;  %v1339_v63 = vmul.u32.u64.low %v1326_v19, %v329_v58  ;;  %v1340_v2 = vmul.u32.u64.high %v1326_v19, %v329_v58, %v1339_v63 }
  0x55   : > { %v341_v8 = vmul.u32 %v1326_v19, %v325_v57  ;;  %v520_v10 = vshll.u32 %v1137_v28, %v508_v56  ;;  %v523_v11 = vshll.u32 %v1138_v30, %v508_v56  ;;  %vm526_vm7 = vcmp.lt.s32.totalorder %v507_v55, 1 }
  0x56   : > { %v510_v12 = vshrl.u32 %v1134_v22, %v509_v3  ;;  %v512_v13 = vshrl.u32 %v1135_v24, %v509_v3  ;;  %v515_v14 = vshrl.u32 %v1136_v26, %v509_v3  ;;  %v518_v15 = vshrl.u32 %v1137_v28, %v509_v3 }
  0x57   : > { %vm343_vm8 = vc.u32 %v1336_v62, %v1339_v63  ;;  %v344_v16 = vadd.s32 1, %v1340_v2  ;;  %v521_v17 = vshrl.u32 %v1138_v30, %v509_v3  ;;  %vm527_vm9 = vcmp.lt.s32.totalorder %v507_v55, 2 }
  0x58   : > { %v513_v18 = vor.u32 %v512_v13, %v511_v4  ;;  %v516_v20 = vor.u32 %v515_v14, %v514_v6  ;;  %v519_v21 = vor.u32 %v518_v15, %v517_v7  ;;  %v524_v23 = vshrl.u32 %v1139_v38, %v509_v3 }
  0x59   : > { %v345_v25 = vsel %vm343_vm8, %v344_v16, %v1340_v2  ;;  %v522_v19 = vor.u32 %v521_v17, %v520_v10  ;;  %vm528_vm10 = vcmp.lt.s32.totalorder %v507_v55, 3  ;;  %vm529_vm11 = vcmp.lt.s32.totalorder %v507_v55, 4 }
  0x5a   : > { %v346_v27 = vadd.s32 %v345_v25, %v341_v8  ;;  %v525_v22 = vor.u32 %v524_v23, %v523_v11  ;;  %v530_v24 = vsel %vm526_vm7, %v510_v12, %v513_v18  ;;  %v531_v26 = vsel %vm529_vm11, %v519_v21, 2102212464 }
  0x5b   : > { %v532_v28 = vsel %vm528_vm10, %v516_v20, %v531_v26  ;;  %v534_v29 = vsel %vm526_vm7, %v513_v18, %v516_v20  ;;  %v535_v31 = vsel %vm529_vm11, %v522_v19, 920167782  ;;  %v538_v30 = vsel %vm526_vm7, %v516_v20, %v519_v21 }
  0x5c   : > { %v347_v32 = vadd.s32 536870912, %v346_v27  ;;  %v536_v33 = vsel %vm528_vm10, %v519_v21, %v535_v31  ;;  %v539_v34 = vsel %vm529_vm11, %v525_v22, 1326507024  ;;  %v533_v35 = vsel %vm527_vm9, %v530_v24, %v532_v28 }
  0x5d   : > { %v537_v36 = vsel %vm527_vm9, %v534_v29, %v536_v33  ;;  %v540_v37 = vsel %vm528_vm10, %v522_v19, %v539_v34  ;;  %v549_v45 = vmul.u32 %v542_v60, %v533_v35  ;;  %v342_v57 = vadd.s32 %v1339_v63, %v1336_v62 }
  0x5e   : > { %v348_v38 = vshrl.u32 %v347_v32, 30  ;;  %v541_v39 = vsel %vm527_vm9, %v538_v30, %v540_v37  ;;  %v1352_v40 = vmul.u32.u64.low %v542_v60, %v537_v36  ;;  %v1353_v41 = vmul.u32.u64.high %v542_v60, %v537_v36, %v1352_v40 }
  0x5f   : > { %v1355_v42 = vmul.u32.u64.low %v542_v60, %v541_v39  ;;  %v1356_v43 = vmul.u32.u64.high %v542_v60, %v541_v39, %v1355_v42  ;;  %v1367_v60 = vld [vmem:[%s271_s10] sm:$0xff]  ;;  %vm496_vm2 = vcmp.lt.s32.totalorder %v1318_v5, 0  ;;  %vm495_vm3 = vcmp.le.f32.partialorder %v494_v9, 0.7853982 }
  0x60   : > { %v349_v44 = vshll.u32 %v348_v38, 30  ;;  %v552_v47 = vadd.s32 1, %v1353_v41  ;;  %v702_v10 = vmul.f32 %v1367_v60, %v1367_v60  ;;  %v372_v20 = vsub.s32 4, %v348_v38 }
  0x61   : > { %vm551_vm12 = vc.u32 %v1356_v43, %v1352_v40  ;;  %v550_v17 = vadd.s32 %v1352_v40, %v1356_v43 }
  0x62   : > { %v350_v46 = vsub.s32 %v346_v27, %v349_v44  ;;  %v553_v49 = vsel %vm551_vm12, %v552_v47, %v1353_v41  ;;  %v703_v15 = vsub.f32 1.0, %v702_v10  ;;  %v373_v29 = vsel %vm288_vm15, %v372_v20, %v348_v38 }
  0x63   : > { %v554_v50 = vadd.s32 %v553_v49, %v549_v45  ;;  %v375_v33 = vsel %vm287_vm1, 0, %v373_v29  ;;  %vm378_vm12 = vweird.f32 %v1311_v0 }
  0x64   : > { %v352_v48 = vsub.s32 0, %v350_v46  ;;  %v704_v27 = vmax.f32 %v703_v15, 0.0  ;;  %v482_v39 = vadd.s32 3, %v375_v33  ;;  %v379_v1 = vand.u32 3, %v375_v33 }
  0x65   : > { %v555_v52 = vadd.s32 536870912, %v554_v50 }
  0x66   : > { %v908_v51 = vmin.u32 %v352_v48, %v350_v46  ;;  %1015 = vrsqrt.f32 %v704_v27  ;;  %v483_v42 = vand.u32 3, %v482_v39  ;;  %vm381_vm4 = vcmp.eq.s32.totalorder %v379_v1, 0 }
  0x67   : > { %v556_v54 = vshrl.u32 %v555_v52, 30  ;;  %vm384_vm5 = vcmp.eq.s32.totalorder %v379_v1, 2  ;;  %vm380_vm8 = vcmp.lt.s32.totalorder %v379_v1, 2  ;;  %vm707_vm10 = vcmp.eq.f32.partialorder %v704_v27, inf }
  0x68   : > { %v354_v53 = vclz %v908_v51  ;;  %vm485_vm6 = vcmp.eq.s32.totalorder %v483_v42, 0  ;;  %vm488_vm7 = vcmp.eq.s32.totalorder %v483_v42, 2  ;;  %vm484_vm9 = vcmp.lt.s32.totalorder %v483_v42, 2 }
  0x69   : > { %v557_v56 = vshll.u32 %v556_v54, 30  ;;  %v580_v37 = vsub.s32 4, %v556_v54  ;;  %vm709_vm11 = vcmp.eq.f32.partialorder %v704_v27, 0.0 }
  0x6a   : > { %v909_v55 = vadd.s32 4294967294, %v354_v53 }
  0x6b   : > { %v558_v59 = vsub.s32 %v554_v50, %v557_v56  ;;  %v581_v41 = vsel %vm496_vm2, %v580_v37, %v556_v54  ;;  %v710_v56 = vand.u32 2147483648, %v704_v27 }
  0x6c   : > { %vm910_vm13 = vcmp.lt.s32.totalorder %v909_v55, 0  ;;  %v583_v47 = vsel %vm495_vm3, 0, %v581_v41 }
  0x6d   : > { %v357_v58 = vsel %vm910_vm13, 0, %v909_v55  ;;  %v560_v4 = vsub.s32 0, %v558_v59  ;;  %v690_v51 = vadd.s32 3, %v583_v47 }
  0x6e   : > { %v358_v61 = vsub.s32 32, %v357_v58  ;;  %v359_v2 = vshll.u32 %v350_v46, %v357_v58  ;;  %v362_v3 = vsub.s32 4294967266, %v357_v58 }
  0x6f   : > { %v916_v8 = vmin.u32 %v560_v4, %v558_v59  ;;  %v691_v58 = vand.u32 3, %v690_v51 }
  0x70   : > { %v360_v6 = vshrl.u32 %v342_v57, %v358_v61  ;;  %v363_v7 = vadd.s32 127, %v362_v3  ;;  %v1016_v43 = vpop.eup %1015  ;;  %v587_v57 = vand.u32 3, %v583_v47 }
  0x71   : > { %v562_v11 = vclz %v916_v8  ;;  %v706_v9 = vmul.f32 %v1016_v43, %v704_v27 }
  0x72   : > { %v361_v62 = vor.u32 %v360_v6, %v359_v2  ;;  %v364_v63 = vshll.u32 %v363_v7, 23  ;;  %vm592_vm13 = vcmp.eq.s32.totalorder %v587_v57, 2 }
  0x73   : > { %v917_v14 = vadd.s32 4294967294, %v562_v11 }
  0x74   : > { %v365_v12 = vor.u32 4788187, %v364_v63  ;;  %v368_v13 = vcvt.s32.f32 %v361_v62 }
  0x75   : > { %vm918_vm14 = vcmp.lt.s32.totalorder %v917_v14, 0 }
  0x76   : > { %v366_v16 = vand.u32 2147483647, %v365_v12  ;;  %v565_v21 = vsel %vm918_vm14, 0, %v917_v14  ;;  %vm696_vm14 = vcmp.eq.s32.totalorder %v691_v58, 2 }
  0x77   : > { %v566_v23 = vsub.s32 32, %v565_v21  ;;  %v567_v25 = vshll.u32 %v558_v59, %v565_v21  ;;  %v570_v19 = vsub.s32 4294967266, %v565_v21  ;;  %v708_v59 = vsel %vm707_vm10, %v704_v27, %v706_v9 }
  0x78   : > { %v369_v18 = vmul.f32 %v368_v13, %v366_v16  ;;  %v711_v3 = vsel %vm709_vm11, %v710_v56, %v708_v59 }
  0x79   : > { %v568_v24 = vshrl.u32 %v550_v17, %v566_v23  ;;  %v571_v26 = vadd.s32 127, %v570_v19 }
  0x7a   : > { %v370_v22 = vxor.u32 2147483648, %v369_v18 }
  0x7b   : > { %v569_v30 = vor.u32 %v568_v24, %v567_v25  ;;  %v572_v32 = vshll.u32 %v571_v26, 23 }
  0x7c   : > { %v371_v28 = vsel %vm288_vm15, %v370_v22, %v369_v18  ;;  %vm589_vm15 = vcmp.eq.s32.totalorder %v587_v57, 0 }
  0x7d   : > { %v374_v31 = vsel %vm287_vm1, %v1311_v0, %v371_v28  ;;  %v573_v34 = vor.u32 4788187, %v572_v32  ;;  %v576_v35 = vcvt.s32.f32 %v569_v30  ;;  %vm693_vm1 = vcmp.eq.s32.totalorder %v691_v58, 0 }
  0x7e   : > { %1017 = vcosq.f32 %v374_v31 }
  0x7f   : > { %1019 = vsinq.f32 %v374_v31  ;;  %v574_v36 = vand.u32 2147483647, %v573_v34 }
  0x81   : > { %v577_v40 = vmul.f32 %v576_v35, %v574_v36 }
  0x83   : > { %v578_v38 = vxor.u32 2147483648, %v577_v40 }
  0x85   : > { %v579_v44 = vsel %vm496_vm2, %v578_v38, %v577_v40  ;;  %vm586_vm2 = vweird.f32 %v1318_v5 }
  0x86   : > { %v582_v46 = vsel %vm495_vm3, %v1318_v5, %v579_v44  ;;  %vm588_vm3 = vcmp.lt.s32.totalorder %v587_v57, 2 }
  0x87   : > { %1021 = vcosq.f32 %v582_v46 }
  0x88   : > { %v1018_v45 = vpop.eup %1017  ;;  %1023 = vsinq.f32 %v582_v46 }
  0x89   : > { %v1020_v48 = vpop.eup %1019  ;;  %v385_v49 = vxor.u32 2147483648, %v1018_v45 }
  0x8a   : > { %v382_v50 = vxor.u32 2147483648, %v1020_v48 }
  0x8b   : > { %v386_v53 = vsel %vm384_vm5, %v385_v49, %v1020_v48  ;;  %v490_v55 = vsel %vm488_vm7, %v385_v49, %v1020_v48 }
  0x8c   : > { %v383_v52 = vsel %vm381_vm4, %v1018_v45, %v382_v50  ;;  %v487_v54 = vsel %vm485_vm6, %v1018_v45, %v382_v50  ;;  %vm692_vm4 = vcmp.lt.s32.totalorder %v691_v58, 2 }
  0x8d   : > { %v387_v61 = vsel %vm380_vm8, %v383_v52, %v386_v53  ;;  %v491_v2 = vsel %vm484_vm9, %v487_v54, %v490_v55 }
  0x8e   : > { %v388_v6 = vsel %vm378_vm12, nan, %v387_v61  ;;  %v492_v7 = vsel %vm378_vm12, nan, %v491_v2 }
  0x8f   : > { %v712_v12 = vmul.f32 %v388_v6, %v1367_v60  ;;  %v713_v13 = vmul.f32 %v711_v3, %v492_v7 }
  0x91   : > { %v1022_v4 = vpop.eup %1021  ;;  %v714_v23 = vsub.f32 %v712_v12, %v713_v13 }
  0x92   : > { %v1024_v8 = vpop.eup %1023  ;;  %v593_v10 = vxor.u32 2147483648, %v1022_v4 }
  0x93   : > { %v590_v62 = vxor.u32 2147483648, %v1024_v8 }
  0x94   : > { %v594_v63 = vsel %vm592_vm13, %v593_v10, %v1024_v8  ;;  %v698_v11 = vsel %vm696_vm14, %v593_v10, %v1024_v8 }
  0x95   : > { %v591_v14 = vsel %vm589_vm15, %v1022_v4, %v590_v62  ;;  %v695_v15 = vsel %vm693_vm1, %v1022_v4, %v590_v62 }
  0x96   : > { %v595_v16 = vsel %vm588_vm3, %v591_v14, %v594_v63  ;;  %v699_v17 = vsel %vm692_vm4, %v695_v15, %v698_v11 }
  0x97   : > { %v596_v18 = vsel %vm586_vm2, nan, %v595_v16  ;;  %v700_v20 = vsel %vm586_vm2, nan, %v699_v17 }
  0x98   : > { %v701_v21 = vmul.f32 %v700_v20, %v1311_v0  ;;  %vm715_vm5 = vcmp.gt.f32.partialorder %v1367_v60, %v596_v18 }
  0x9a   : > { %v716_v5 = vsub.f32 %v1367_v60, %v701_v21 }
  0x9c   : > { %v717_v25 = vsel %vm715_vm5, %v714_v23, %v716_v5 }
  0x9d   : > { %v718_v19 = vmul.f32 30.0, %v717_v25 }
  0x9f   : > { %720 = vst.msk [vmem:[#allocation4] sm:$0xff] %vm719_vm0, %v718_v19 }
  0xa0 PF: > { %v732_v27 = vld [vmem:[%s267_s27] sm:$0xff]  ;;  %v1140_v22 = vmov 0   ;;  %v725_v60 = vlaneseq  ;;  %s923_s7 = sshll.u32 %s1113_s18, 7  ;;  %vm764_vm7 = vcmask 7168   ;;  %p924_p11 = scmp.ne.s32.totalorder %s1113_s18, 3 }
  0xa1   : > { %1025 = vset.pattern.permute.xlu0 %v1140_v22  ;;  %1026 = vset.pattern.permute.xlu1 %v1140_v22  ;;  %v728_v26 = vstv %s923_s7  ;;  %v723_v28 = vld [vmem:[%s228_s28] sm:$0xff]  ;;  %v748_v44 = vld [vmem:[#allocation3] sm:$0xff] }
  0xa2   : > { %734 = vperm.xlu0 %1025, %v732_v27   ;;  %v726_v24 = vand.u32 127, %v725_v60  ;;  %v724_v31 = vmul.f32 30.0, %v723_v28  ;;  %v744_v35 = vld [vmem:[#allocation2] sm:$0xff] }
  0xa4   : > { %v729_v29 = vadd.s32 %v728_v26, %v726_v24 }
  0xa6   : > { %v737_v0 = vld [vmem:[#allocation4] sm:$0xff]  ;;  %vm730_vm0 = vcmp.lt.s32.totalorder %v729_v29, 500 }
  0xa7   : > { %740 = vperm.xlu0 %1025, %v737_v0   ;;  %v731_v32 = vsel %vm730_vm0, %v724_v31, -1e+30  ;;  %v776_v9 = vld [vmem:[#allocation4] sm:$0xff] (!%p924_p11) }
 0x121   : > { %v735_v30 = vpop.permute.xlu0 %734 }
 0x122   : > { %vm736_vm6 = vcmp.eq.s32.totalorder %v729_v29, %v735_v30 }
 0x126   : > { %v741_v33 = vpop.permute.xlu0 %740 }
 0x127   : > { %v743_v34 = vsel %vm736_vm6, %v741_v33, %v731_v32 }
 0x128   : > { %745 = vmax.xlane.f32.xlu1 %v743_v34 }
 0x1b5   : > { %v746_v36 = vpop.xlane.xlu1 %745 }
 0x1b6   : > { %v747_v37 = vmax.f32 %v744_v35, %v746_v36 }
 0x1b8   : > { %v749_v39 = vsub.f32 %v744_v35, %v747_v37  ;;  %766 = vst.msk [vmem:[#allocation2] sm:$0xff] %vm764_vm7, %v747_v37  ;;  %755 = vperm.xlu1 %1026, %v747_v37  }
 0x1ba   : > { %v750_v42 = vmul.f32 1.442695, %v749_v39 }
 0x1bf   : > { %v771_v50 = vld [vmem:[#allocation2] sm:$0xff] (!%p924_p11) }
 0x237   : > { %v756_v40 = vpop.permute.xlu1 %755 }
 0x238   : > { %v758_v1 = vsub.f32 %v743_v34, %v756_v40 }
 0x23a   : > { %v759_v38 = vmul.f32 1.442695, %v758_v1 }
 0x23c   : > { %1027 = vpow2.f32 %v759_v38 }
 0x23d   : > { %1029 = vpow2.f32 %v750_v42 }
 0x246   : > { %v1028_v41 = vpop.eup %1027 }
 0x247   : > { %761 = vadd.xlane.f32.xlu0 %v1028_v41  ;;  %v1030_v43 = vpop.eup %1029 }
 0x248   : > { %v752_v45 = vmul.f32 %v1030_v43, %v748_v44 }
 0x2d1   : > { %770 = sbr.rel (%p924_p11) target bundleno = 753 (0x2f1), region = 48 }
 0x2d4   : > { %v762_v46 = vpop.xlane.xlu0 %761 }
 0x2d5   : > { %v763_v47 = vadd.f32 %v762_v46, %v752_v45 }
 0x2d7   : > { %765 = vst.msk [vmem:[#allocation3] sm:$0xff] %vm764_vm7, %v763_v47 }
 0x2de   : > { %v772_v48 = vld [vmem:[#allocation3] sm:$0xff] }
 0x2df   : > { %1031 = vlog2.f32 %v772_v48 }
 0x2e9   : > { %v1032_v49 = vpop.eup %1031 }
 0x2ea   : > { %v774_v51 = vmul.f32 0.6931472, %v1032_v49 }
 0x2ec   : > { %v775_v52 = vadd.f32 %v774_v51, %v771_v50 }
 0x2ee   : > { %v777_v53 = vsub.f32 %v775_v52, %v776_v9 }
 0x2f0   : > { %778 = vst.msk [vmem:[%s279_s19] sm:$0xff] %vm764_vm7, %v777_v53 }
 0x2f1 PF: > { %s17_s22 = sadd.s32 1, %s1129_s22   ;;  %s1438_s15 = smov %s1105_s16 }
 0x2f2   : > { %p14_p12 = scmp.ge.s32.totalorder %s17_s22, 10   ;;  %s1439_s16 = smov %s1109_s17 }
 0x2f3   : > { %s1440_s17 = smov %s1233_s9  ;;  %s1441_s18 = smov %s1121_s20 }
 0x2f4   : > { %s1442_s19 = smov %s1125_s21  ;;  %s1443_s20 = smov %s1446_s24 }
 0x2f5   : > { %s1444_s21 = smov %s1450_s25  ;;  %16 = sbr.rel (!%p14_p12) target bundleno = 5 (0x5), region = 93 }
 0x2fc   :  { %798 = vsyncpa [#allocation6], 1 }
 0x2fd   :  { %800 = vsyncpa [#allocation6 + $0x1], 1 }

</bundles_post_ra>
